<compile_context>
chip_gen: v6e
topology: v6e:2x2x1
jax: 0.10.0
libtpu: 0.0.40
codegen_flags: <defaults>
</compile_context>

<pallas_src>
import jax
import jax.numpy as jnp
from jax.experimental import pallas as pl
from jax.experimental.pallas import tpu as pltpu


def _round_up(x, m):
    return ((x + m - 1) // m) * m


# ----------------------------------------------------------------------------
# Fused kernel builder: conv1d(+bias+relu+maxpool) -> LSTM -> Linear
# ----------------------------------------------------------------------------
def _make_kernel(*, Lp, Bp, H, O, out_size, offs, unrolled):
    """All shape parameters and slab row offsets are closed over statically."""
    off_wih, off_whh, off_bg, off_wfc, off_bfc = offs
    f32 = jnp.float32

    def kernel(p_ref, wcb_ref, wbig_ref, out_ref, *scratch):
        # ---- static, 8-aligned slices of the packed weight slab -------------
        wih = wbig_ref[off_wih:off_wih + O, :]      # (O, 4H)   input->hidden
        whh = wbig_ref[off_whh:off_whh + H, :]      # (H, 4H)   hidden->hidden
        bg = wbig_ref[off_bg:off_bg + 1, :]         # (1, 4H)   b_ih + b_hh
        wfc = wbig_ref[off_wfc:off_wfc + H, :]      # (H, 4H)   fc (lanes>=out are 0)
        bfc = wbig_ref[off_bfc:off_bfc + 1, :]      # (1, 4H)

        # ---- 1. conv1d + bias + ReLU for even & odd positions: ONE matmul ----
        # p_ref rows [0, Lp*Bp) are the even pooling positions, rows
        # [Lp*Bp, 2*Lp*Bp) the odd ones; the last column of p_ref is 1.0 so the
        # conv bias rides inside wcb.
        conv = jnp.maximum(
            jnp.dot(p_ref[...], wcb_ref[...], preferred_element_type=f32), 0.0)
        half = Lp * Bp                                # multiple of 8 -> free split
        x_all = jnp.maximum(conv[:half, :], conv[half:, :])   # MaxPool(2,2)

        # ---- 2. hoisted input->hidden projection for ALL steps (one matmul) --
        xg_all = jnp.dot(x_all, wih, preferred_element_type=f32) + bg  # (Lp*Bp, 4H)

        # ---- gate nonlinearities: 3 EUP pushes per step (1 sigmoid + 2 tanh) -
        def gates_to_hc(gates, c_prev):
            sg = jax.nn.sigmoid(gates)                 # one push over full (Bp,4H)
            i_g = sg[:, 0:H]                           # PyTorch gate order i,f,g,o
            f_g = sg[:, H:2 * H]
            o_g = sg[:, 3 * H:4 * H]
            g_g = jnp.tanh(gates[:, 2 * H:3 * H])
            c = f_g * c_prev + i_g * g_g
            h = o_g * jnp.tanh(c)
            return h, c

        # ---- 3./4. recurrence: peel t=0 (h=c=0), ONE matmul per later step ---
        if unrolled:
            # Static slices of xg_all stay in vregs; no scratch round-trip.
            h, c = gates_to_hc(xg_all[0:Bp, :], jnp.zeros((Bp, H), f32))
            for t in range(1, Lp):
                gates = (xg_all[t * Bp:(t + 1) * Bp, :]
                         + jnp.dot(h, whh, preferred_element_type=f32))
                h, c = gates_to_hc(gates, c)
        else:
            # Large Lp: single full-tile store of the projections, then a rolled
            # loop with 8-aligned dynamic-slice loads.
            xg_ref, = scratch
            xg_ref[...] = xg_all
            h0, c0 = gates_to_hc(xg_ref[pl.ds(0, Bp), :],
                                 jnp.zeros((Bp, H), f32))

            def step(t, carry):
                h, c = carry
                row = pl.multiple_of(t * Bp, 8)
                gates = (xg_ref[pl.ds(row, Bp), :]
                         + jnp.dot(h, whh, preferred_element_type=f32))
                return gates_to_hc(gates, c)

            h, c = jax.lax.fori_loop(1, Lp, step, (h0, c0))

        # ---- 5. final linear layer on the last hidden state ------------------
        fc = jnp.dot(h, wfc, preferred_element_type=f32) + bfc   # (Bp, 4H)
        out_ref[...] = fc[:, :out_size]

    return kernel


# ----------------------------------------------------------------------------
# Wrapper: batch padding, im2col, operand packing, single pallas_call
# ----------------------------------------------------------------------------
def cnn_lstm_forward(x, params, *, unroll_max_steps=16):
    # x: (B, C_in, L) float32 (PyTorch NCW layout)
    x = x.astype(jnp.float32)
    B, C_in, L = x.shape
    conv_w = params["conv_w"]          # (O, C_in, K)
    conv_b = params["conv_b"]          # (O,)
    O, _, K = conv_w.shape
    H = params["lstm_w_hh"].shape[1]
    out_size = params["fc_w"].shape[0]
    G = 4 * H

    # Pad batch to a sublane multiple so every in-kernel tile is (8,128)-aligned.
    Bp = _round_up(max(B, 1), 8)
    xb = jnp.pad(x, ((0, Bp - B), (0, 0), (0, 0)))

    # --- im2col for conv1d(k=K, padding=1); merged even/odd pooling slab ------
    xpad = jnp.pad(xb, ((0, 0), (0, 0), (1, 1)))                           # (Bp,C_in,L+2)
    patches = jnp.stack([xpad[:, :, k:k + L] for k in range(K)], axis=-1)  # (Bp,C_in,L,K)
    patches = patches.transpose(2, 0, 1, 3).reshape(L, Bp, C_in * K)       # time-major
    Lp = L // 2                                                            # MaxPool floors
    pe = patches[0:2 * Lp:2].reshape(Lp * Bp, C_in * K)                    # even positions
    po = patches[1:2 * Lp:2].reshape(Lp * Bp, C_in * K)                    # odd positions
    p_all = jnp.concatenate([pe, po], axis=0)                              # (2*Lp*Bp, C_in*K)
    p_aug = jnp.concatenate(
        [p_all, jnp.ones((2 * Lp * Bp, 1), jnp.float32)], axis=-1)         # ones col = bias
    # TODO(synk): for large L/B, build the patch slab in-kernel with shifted
    # pl.ds loads from an (L+2, Bp*C_in) layout instead of HBM im2col.

    # --- packed conv slab: [wc ; bc] -> (C_in*K + 1, O) -----------------------
    wc = conv_w.transpose(1, 2, 0).reshape(C_in * K, O)                    # [c*K+k, o]
    wcb = jnp.concatenate([wc, conv_b.reshape(1, O)], axis=0)

    # --- packed lane-dense slab: wih / whh / bg / wfc / bfc (8-aligned rows) --
    off_wih = 0
    off_whh = _round_up(off_wih + O, 8)
    off_bg = _round_up(off_whh + H, 8)
    off_wfc = off_bg + 8
    off_bfc = _round_up(off_wfc + H, 8)
    R = off_bfc + 8
    wbig = jnp.zeros((R, G), jnp.float32)
    wbig = wbig.at[off_wih:off_wih + O, :].set(params["lstm_w_ih"].T)      # (O, 4H)
    wbig = wbig.at[off_whh:off_whh + H, :].set(params["lstm_w_hh"].T)      # (H, 4H)
    wbig = wbig.at[off_bg, :].set(params["lstm_b_ih"] + params["lstm_b_hh"])
    wbig = wbig.at[off_wfc:off_wfc + H, :out_size].set(params["fc_w"].T)   # (H, out)
    wbig = wbig.at[off_bfc, :out_size].set(params["fc_b"])

    unrolled = Lp <= unroll_max_steps
    kernel = _make_kernel(Lp=Lp, Bp=Bp, H=H, O=O, out_size=out_size,
                          offs=(off_wih, off_whh, off_bg, off_wfc, off_bfc),
                          unrolled=unrolled)
    scratch_shapes = [] if unrolled else [pltpu.VMEM((Lp * Bp, G), jnp.float32)]

    vmem = pl.BlockSpec(memory_space=pltpu.MemorySpace.VMEM)
    out = pl.pallas_call(
        kernel,
        out_shape=jax.ShapeDtypeStruct((Bp, out_size), jnp.float32),
        in_specs=[vmem, vmem, vmem],
        out_specs=vmem,
        scratch_shapes=scratch_shapes,
        # NOTE: at scale, add a batch-parallel grid (v7x has 2 TensorCores) and
        # an explicit vmem_limit_bytes; at Bp=8 a single program is optimal.
    )(p_aug, wcb, wbig)
    return out[:B]


# ----------------------------------------------------------------------------
# Pure-JAX reference (mirrors the PyTorch forward) for a correctness check
# ----------------------------------------------------------------------------
def reference_forward(x, params):
    x = x.astype(jnp.float32)
    W, b = params["conv_w"], params["conv_b"]
    B, C_in, L = x.shape
    O, _, K = W.shape
    xp = jnp.pad(x, ((0, 0), (0, 0), (1, 1)))
    y = jnp.zeros((B, O, L), jnp.float32)
    for k in range(K):
        y = y + jnp.einsum("bcl,oc->bol", xp[:, :, k:k + L], W[:, :, k])
    y = jnp.maximum(y + b[None, :, None], 0.0)
    Lp = L // 2
    y = y[:, :, :2 * Lp].reshape(B, O, Lp, 2).max(axis=-1)
    seq = y.transpose(0, 2, 1)                                             # (B, Lp, O)

    Wih, Whh = params["lstm_w_ih"], params["lstm_w_hh"]
    bih, bhh = params["lstm_b_ih"], params["lstm_b_hh"]
    H = Whh.shape[1]
    h = jnp.zeros((B, H), jnp.float32)
    c = jnp.zeros((B, H), jnp.float32)
    for t in range(Lp):
        gates = seq[:, t, :] @ Wih.T + h @ Whh.T + bih + bhh
        i = jax.nn.sigmoid(gates[:, 0:H])
        f = jax.nn.sigmoid(gates[:, H:2 * H])
        g = jnp.tanh(gates[:, 2 * H:3 * H])
        o = jax.nn.sigmoid(gates[:, 3 * H:4 * H])
        c = f * c + i * g
        h = o * jnp.tanh(c)
    return h @ params["fc_w"].T + params["fc_b"]


# ----------------------------------------------------------------------------
def make_params(key, c_in=1, conv_out=16, kernel=3, hidden=32, out_size=1):
    ks = jax.random.split(key, 8)
    s = 0.1
    return {
        "conv_w":    s * jax.random.normal(ks[0], (conv_out, c_in, kernel), jnp.float32),
        "conv_b":    s * jax.random.normal(ks[1], (conv_out,), jnp.float32),
        "lstm_w_ih": s * jax.random.normal(ks[2], (4 * hidden, conv_out), jnp.float32),
        "lstm_w_hh": s * jax.random.normal(ks[3], (4 * hidden, hidden), jnp.float32),
        "lstm_b_ih": s * jax.random.normal(ks[4], (4 * hidden,), jnp.float32),
        "lstm_b_hh": s * jax.random.normal(ks[5], (4 * hidden,), jnp.float32),
        "fc_w":      s * jax.random.normal(ks[6], (out_size, hidden), jnp.float32),
        "fc_b":      s * jax.random.normal(ks[7], (out_size,), jnp.float32),
    }


if __name__ == "__main__":
    import numpy as np

    B, C_in, L = 2, 1, 8          # batch, input channels, sequence length
    H, OUT = 32, 1                # lstm hidden size (4H = 128), output size

    key = jax.random.PRNGKey(0)
    k_x, k_p = jax.random.split(key)
    x = jax.random.normal(k_x, (B, C_in, L), jnp.float32)
    params = make_params(k_p, c_in=C_in, conv_out=16, kernel=3, hidden=H, out_size=OUT)

    out = cnn_lstm_forward(x, params)
    out = jax.block_until_ready(out)

    ref = jax.block_until_ready(reference_forward(x, params))
    np.testing.assert_allclose(np.asarray(out), np.asarray(ref), rtol=1e-4, atol=1e-4)

    print("KERNEL_OK")
</pallas_src>

<mosaic_0001>
module attributes {stable_mosaic.version = 11 : i64} {
  func.func @kernel(%arg0: memref<64x4xf32, #tpu.memory_space<vmem>>, %arg1: memref<4x16xf32, #tpu.memory_space<vmem>>, %arg2: memref<96x128xf32, #tpu.memory_space<vmem>>, %arg3: memref<8x1xf32, #tpu.memory_space<vmem>>) attributes {dimension_semantics = [], scalar_prefetch = 0 : i64, scratch_operands = 0 : i64, tpu.core_type = #tpu.core_type<tc>} {
    %c0 = arith.constant 0 : index
    %c0_0 = arith.constant 0 : index
    %0 = vector.load %arg2[%c0, %c0_0] : memref<96x128xf32, #tpu.memory_space<vmem>>, vector<16x128xf32>
    %c16 = arith.constant 16 : index
    %c0_1 = arith.constant 0 : index
    %1 = vector.load %arg2[%c16, %c0_1] : memref<96x128xf32, #tpu.memory_space<vmem>>, vector<32x128xf32>
    %c48 = arith.constant 48 : index
    %c0_2 = arith.constant 0 : index
    %2 = vector.load %arg2[%c48, %c0_2] : memref<96x128xf32, #tpu.memory_space<vmem>>, vector<1x128xf32>
    %c56 = arith.constant 56 : index
    %c0_3 = arith.constant 0 : index
    %3 = vector.load %arg2[%c56, %c0_3] : memref<96x128xf32, #tpu.memory_space<vmem>>, vector<32x128xf32>
    %c88 = arith.constant 88 : index
    %c0_4 = arith.constant 0 : index
    %4 = vector.load %arg2[%c88, %c0_4] : memref<96x128xf32, #tpu.memory_space<vmem>>, vector<1x128xf32>
    %c0_5 = arith.constant 0 : index
    %c0_6 = arith.constant 0 : index
    %5 = vector.load %arg0[%c0_5, %c0_6] : memref<64x4xf32, #tpu.memory_space<vmem>>, vector<64x4xf32>
    %c0_7 = arith.constant 0 : index
    %c0_8 = arith.constant 0 : index
    %6 = vector.load %arg1[%c0_7, %c0_8] : memref<4x16xf32, #tpu.memory_space<vmem>>, vector<4x16xf32>
    %cst = arith.constant dense<0.000000e+00> : vector<64x16xf32>
    %7 = tpu.matmul %5, %6, %cst {dimension_numbers = #tpu.dot_dimension_numbers<[1], [0], [0], [1], [0, 0, 1, 1], [], []>} : vector<64x4xf32>, vector<4x16xf32>, vector<64x16xf32> -> vector<64x16xf32>
    %cst_9 = arith.constant 0.000000e+00 : f32
    %8 = vector.broadcast %cst_9 : f32 to vector<64x16xf32>
    %9 = arith.maximumf %7, %8 : vector<64x16xf32>
    %10 = vector.extract_strided_slice %9 {offsets = [0, 0], sizes = [32, 16], strides = [1, 1]} : vector<64x16xf32> to vector<32x16xf32>
    %11 = vector.extract_strided_slice %9 {offsets = [32, 0], sizes = [32, 16], strides = [1, 1]} : vector<64x16xf32> to vector<32x16xf32>
    %12 = arith.maximumf %10, %11 : vector<32x16xf32>
    %cst_10 = arith.constant dense<0.000000e+00> : vector<32x128xf32>
    %13 = tpu.matmul %12, %0, %cst_10 {dimension_numbers = #tpu.dot_dimension_numbers<[1], [0], [0], [1], [0, 0, 1, 1], [], []>} : vector<32x16xf32>, vector<16x128xf32>, vector<32x128xf32> -> vector<32x128xf32>
    %14 = vector.broadcast %2 : vector<1x128xf32> to vector<32x128xf32>
    %15 = arith.addf %13, %14 : vector<32x128xf32>
    %16 = vector.extract_strided_slice %15 {offsets = [0, 0], sizes = [8, 128], strides = [1, 1]} : vector<32x128xf32> to vector<8x128xf32>
    %cst_11 = arith.constant 0.000000e+00 : f32
    %17 = vector.broadcast %cst_11 : f32 to vector<8x32xf32>
    %18 = arith.negf %16 : vector<8x128xf32>
    %19 = math.exp %18 : vector<8x128xf32>
    %cst_12 = arith.constant 1.000000e+00 : f32
    %20 = vector.broadcast %cst_12 : f32 to vector<8x128xf32>
    %21 = arith.addf %20, %19 : vector<8x128xf32>
    %22 = arith.divf %20, %21 : vector<8x128xf32>
    %23 = vector.extract_strided_slice %22 {offsets = [0, 0], sizes = [8, 32], strides = [1, 1]} : vector<8x128xf32> to vector<8x32xf32>
    %24 = vector.extract_strided_slice %22 {offsets = [0, 32], sizes = [8, 32], strides = [1, 1]} : vector<8x128xf32> to vector<8x32xf32>
    %25 = vector.extract_strided_slice %22 {offsets = [0, 96], sizes = [8, 32], strides = [1, 1]} : vector<8x128xf32> to vector<8x32xf32>
    %26 = vector.extract_strided_slice %16 {offsets = [0, 64], sizes = [8, 32], strides = [1, 1]} : vector<8x128xf32> to vector<8x32xf32>
    %27 = math.tanh %26 : vector<8x32xf32>
    %28 = arith.mulf %24, %17 : vector<8x32xf32>
    %29 = arith.mulf %23, %27 : vector<8x32xf32>
    %30 = arith.addf %28, %29 : vector<8x32xf32>
    %31 = math.tanh %30 : vector<8x32xf32>
    %32 = arith.mulf %25, %31 : vector<8x32xf32>
    %33 = vector.extract_strided_slice %15 {offsets = [8, 0], sizes = [8, 128], strides = [1, 1]} : vector<32x128xf32> to vector<8x128xf32>
    %cst_13 = arith.constant dense<0.000000e+00> : vector<8x128xf32>
    %34 = tpu.matmul %32, %1, %cst_13 {dimension_numbers = #tpu.dot_dimension_numbers<[1], [0], [0], [1], [0, 0, 1, 1], [], []>} : vector<8x32xf32>, vector<32x128xf32>, vector<8x128xf32> -> vector<8x128xf32>
    %35 = arith.addf %33, %34 : vector<8x128xf32>
    %36 = arith.negf %35 : vector<8x128xf32>
    %37 = math.exp %36 : vector<8x128xf32>
    %cst_14 = arith.constant 1.000000e+00 : f32
    %38 = vector.broadcast %cst_14 : f32 to vector<8x128xf32>
    %39 = arith.addf %38, %37 : vector<8x128xf32>
    %40 = arith.divf %38, %39 : vector<8x128xf32>
    %41 = vector.extract_strided_slice %40 {offsets = [0, 0], sizes = [8, 32], strides = [1, 1]} : vector<8x128xf32> to vector<8x32xf32>
    %42 = vector.extract_strided_slice %40 {offsets = [0, 32], sizes = [8, 32], strides = [1, 1]} : vector<8x128xf32> to vector<8x32xf32>
    %43 = vector.extract_strided_slice %40 {offsets = [0, 96], sizes = [8, 32], strides = [1, 1]} : vector<8x128xf32> to vector<8x32xf32>
    %44 = vector.extract_strided_slice %35 {offsets = [0, 64], sizes = [8, 32], strides = [1, 1]} : vector<8x128xf32> to vector<8x32xf32>
    %45 = math.tanh %44 : vector<8x32xf32>
    %46 = arith.mulf %42, %30 : vector<8x32xf32>
    %47 = arith.mulf %41, %45 : vector<8x32xf32>
    %48 = arith.addf %46, %47 : vector<8x32xf32>
    %49 = math.tanh %48 : vector<8x32xf32>
    %50 = arith.mulf %43, %49 : vector<8x32xf32>
    %51 = vector.extract_strided_slice %15 {offsets = [16, 0], sizes = [8, 128], strides = [1, 1]} : vector<32x128xf32> to vector<8x128xf32>
    %cst_15 = arith.constant dense<0.000000e+00> : vector<8x128xf32>
    %52 = tpu.matmul %50, %1, %cst_15 {dimension_numbers = #tpu.dot_dimension_numbers<[1], [0], [0], [1], [0, 0, 1, 1], [], []>} : vector<8x32xf32>, vector<32x128xf32>, vector<8x128xf32> -> vector<8x128xf32>
    %53 = arith.addf %51, %52 : vector<8x128xf32>
    %54 = arith.negf %53 : vector<8x128xf32>
    %55 = math.exp %54 : vector<8x128xf32>
    %cst_16 = arith.constant 1.000000e+00 : f32
    %56 = vector.broadcast %cst_16 : f32 to vector<8x128xf32>
    %57 = arith.addf %56, %55 : vector<8x128xf32>
    %58 = arith.divf %56, %57 : vector<8x128xf32>
    %59 = vector.extract_strided_slice %58 {offsets = [0, 0], sizes = [8, 32], strides = [1, 1]} : vector<8x128xf32> to vector<8x32xf32>
    %60 = vector.extract_strided_slice %58 {offsets = [0, 32], sizes = [8, 32], strides = [1, 1]} : vector<8x128xf32> to vector<8x32xf32>
    %61 = vector.extract_strided_slice %58 {offsets = [0, 96], sizes = [8, 32], strides = [1, 1]} : vector<8x128xf32> to vector<8x32xf32>
    %62 = vector.extract_strided_slice %53 {offsets = [0, 64], sizes = [8, 32], strides = [1, 1]} : vector<8x128xf32> to vector<8x32xf32>
    %63 = math.tanh %62 : vector<8x32xf32>
    %64 = arith.mulf %60, %48 : vector<8x32xf32>
    %65 = arith.mulf %59, %63 : vector<8x32xf32>
    %66 = arith.addf %64, %65 : vector<8x32xf32>
    %67 = math.tanh %66 : vector<8x32xf32>
    %68 = arith.mulf %61, %67 : vector<8x32xf32>
    %69 = vector.extract_strided_slice %15 {offsets = [24, 0], sizes = [8, 128], strides = [1, 1]} : vector<32x128xf32> to vector<8x128xf32>
    %cst_17 = arith.constant dense<0.000000e+00> : vector<8x128xf32>
    %70 = tpu.matmul %68, %1, %cst_17 {dimension_numbers = #tpu.dot_dimension_numbers<[1], [0], [0], [1], [0, 0, 1, 1], [], []>} : vector<8x32xf32>, vector<32x128xf32>, vector<8x128xf32> -> vector<8x128xf32>
    %71 = arith.addf %69, %70 : vector<8x128xf32>
    %72 = arith.negf %71 : vector<8x128xf32>
    %73 = math.exp %72 : vector<8x128xf32>
    %cst_18 = arith.constant 1.000000e+00 : f32
    %74 = vector.broadcast %cst_18 : f32 to vector<8x128xf32>
    %75 = arith.addf %74, %73 : vector<8x128xf32>
    %76 = arith.divf %74, %75 : vector<8x128xf32>
    %77 = vector.extract_strided_slice %76 {offsets = [0, 0], sizes = [8, 32], strides = [1, 1]} : vector<8x128xf32> to vector<8x32xf32>
    %78 = vector.extract_strided_slice %76 {offsets = [0, 32], sizes = [8, 32], strides = [1, 1]} : vector<8x128xf32> to vector<8x32xf32>
    %79 = vector.extract_strided_slice %76 {offsets = [0, 96], sizes = [8, 32], strides = [1, 1]} : vector<8x128xf32> to vector<8x32xf32>
    %80 = vector.extract_strided_slice %71 {offsets = [0, 64], sizes = [8, 32], strides = [1, 1]} : vector<8x128xf32> to vector<8x32xf32>
    %81 = math.tanh %80 : vector<8x32xf32>
    %82 = arith.mulf %78, %66 : vector<8x32xf32>
    %83 = arith.mulf %77, %81 : vector<8x32xf32>
    %84 = arith.addf %82, %83 : vector<8x32xf32>
    %85 = math.tanh %84 : vector<8x32xf32>
    %86 = arith.mulf %79, %85 : vector<8x32xf32>
    %cst_19 = arith.constant dense<0.000000e+00> : vector<8x128xf32>
    %87 = tpu.matmul %86, %3, %cst_19 {dimension_numbers = #tpu.dot_dimension_numbers<[1], [0], [0], [1], [0, 0, 1, 1], [], []>} : vector<8x32xf32>, vector<32x128xf32>, vector<8x128xf32> -> vector<8x128xf32>
    %88 = vector.broadcast %4 : vector<1x128xf32> to vector<8x128xf32>
    %89 = arith.addf %87, %88 : vector<8x128xf32>
    %90 = vector.extract_strided_slice %89 {offsets = [0, 0], sizes = [8, 1], strides = [1, 1]} : vector<8x128xf32> to vector<8x1xf32>
    %c0_20 = arith.constant 0 : index
    %c0_21 = arith.constant 0 : index
    %91 = vector.load %arg3[%c0_20, %c0_21] : memref<8x1xf32, #tpu.memory_space<vmem>>, vector<8x1xf32>
    tpu.vector_store %arg3[%c0_20, %c0_21], %90 {strides = array<i32>} : memref<8x1xf32, #tpu.memory_space<vmem>>, vector<8x1xf32>,
    return
  }
}

</mosaic_0001>

<bundles_post_ra>
// kernel: tpu_custom_call.1
= control target key start
LH: loop header
LB: loop body
LE: loop exit
PB: predicated region body
PF: predicated region fallthrough
CT: control target
= control target key end

     0   :  { %8 = vsyncpa [#allocation3], 0  ;;  %s897_s12 = smov [#allocation2]   ;;  %s1021_s0 = inlined_call_operand.vmem [shape: f32[64,4], index: 0, kind: input, shape index: {}]   ;;  %s1022_s1 = inlined_call_operand.vmem [shape: f32[4,16], index: 1, kind: input, shape index: {}]   ;;  %s1023_s2 = inlined_call_operand.hbm [shape: f32[96,128], index: 2, kind: input, shape index: {}]   ;;  %s1024_s3 = inlined_call_operand.vmem [shape: f32[8,1], index: 3, kind: output, shape index: {}]  }
   0x1   :  { %s18_s13 = sshll.u32 %s897_s12, 4  ;;  %s19_s13 = int_to_ptr.vmem [resolvable:$true] %s18_s13 }
   0x2   :  { %s883_s14 = scalar_lea.vmem %s19_s13, 1536  ;;  %p888_p1 = scmp.lt.s32.totalorder %s19_s13, %s19_s13 }
   0x3   :  { %p884_p0 = scmp.ne.s32.totalorder %s19_s13, %s883_s14  ;;  %p889_p2 = scmp.lt.s32.totalorder %s883_s14, %s883_s14 }
   0x5   :  { %p890_p3 = por %p889_p2, %p888_p1 }
   0x7   :  { %p891_p4 = pnand %p890_p3, %p884_p0 }
   0x9   :  { %894 = shalt.err (!%p891_p4)
}
   0xa   :  { %s898_s15 = smov 128   ;;  %s899_s16 = smov 8  }
   0xb   :  { %24 = dma.hbm_to_vmem [thread:$0]  %s1023_s2, 1536, %s19_s13, [#allocation3], %s898_s15, %s898_s15, %s899_s16  }
   0xc   :  { %895 = dma.done.wait [#allocation3], 1536  }
   0xd   :  { %896 = vsyncadd [#allocation3], 4294965760  ;;  %vm74_vm0 = vcmask 1043456   ;;  %vm49_vm1 = vcmask 31744   ;;  %v48_v0 = vld [vmem:[%s1022_s1] sm:$0xf] }
   0xe   :  { %v40_v1 = vld [vmem:[%s1021_s0] sm:$0xff]  ;;  %v41_v2 = vld [vmem:[%s1021_s0 + $0x8] sm:$0xff]  ;;  %766 = vmatprep.subr.msk.mxu0 %vm74_vm0, %v48_v0  ;;  %v42_v3 = vld [vmem:[%s1021_s0 + $0x10] sm:$0xff]  ;;  %834 = vmatprep.subr.msk.mxu1 %vm74_vm0, %v48_v0  ;;  %vm199_vm2 = vcmask 130048   ;;  %s901_s8 = smov 32   ;;  %v902_v49 = vmov 0.0  }
   0xf   :  { %768 = vmatprep.mubr.msk.f32.mxu0 %vm49_vm1, %v40_v1  ;;  %v46_v4 = vld [vmem:[%s1021_s0 + $0x30] sm:$0xff]  ;;  %767 = vmatpush3.msk.msra.mxu0 %vm74_vm0, %v48_v0  ;;  %v47_v5 = vld [vmem:[%s1021_s0 + $0x38] sm:$0xff]  ;;  %v44_v7 = vld [vmem:[%s1021_s0 + $0x20] sm:$0xff]  ;;  %vm903_vm3 = vmmov 0   ;;  %vm324_vm4 = vcmask 261120   ;;  %vm701_vm5 = vcmask 7168  }
  0x10   :  { %769 = vmatmul.mubr.msk.f32.vlgmr.msra.gmra.mxu0 %vm49_vm1, %v41_v2  ;;  %835 = vmatpush3.msk.msra.mxu1 %vm74_vm0, %v48_v0  ;;  %v43_v6 = vld [vmem:[%s1021_s0 + $0x18] sm:$0xff]  ;;  %v45_v8 = vld [vmem:[%s1021_s0 + $0x28] sm:$0xff]  ;;  %v28_v10 = vld [vmem:[#allocation2] sm:$0xff]  ;;  %s900_s0 = smov 64  }
  0x11   :  { %771 = vmatprep.mubr.msk.f32.mxu0 %vm49_vm1, %v42_v3  ;;  %777 = vmatprep.mubr.msk.f32.mxu1 %vm49_vm1, %v46_v4  ;;  %v29_v9 = vld [vmem:[#allocation2 + $0x8] sm:$0xff]  ;;  %v962_v31 = vld [vmem:[#allocation2 + $0x30] ss:$0 sm:$0xff]  ;;  %v32_v50 = vld [vmem:[#allocation2 + $0x20] sm:$0xff] }
  0x12   :  { %778 = vmatmul.mubr.msk.f32.vlgmr.msra.gmra.mxu1 %vm49_vm1, %v47_v5  ;;  %780 = vmatprep.subr.mxu1 %v29_v9  ;;  %v33_v48 = vld [vmem:[#allocation2 + $0x28] sm:$0xff]  ;;  %v31_v51 = vld [vmem:[#allocation2 + $0x18] sm:$0xff]  ;;  %v30_v52 = vld [vmem:[#allocation2 + $0x10] sm:$0xff] }
  0x13   :  { %781 = vmatpush3.msra.mxu1 %v29_v9  ;;  %801 = vmatprep.subr.mxu0 %v902_v49 }
  0x14   :  { %772 = vmatmul.mubr.msk.f32.gmra.mxu0 %vm49_vm1, %v43_v6  ;;  %782 = vmatprep.subr.mxu1 %v28_v10 }
  0x15   :  { %774 = vmatprep.mubr.msk.f32.mxu0 %vm49_vm1, %v44_v7  ;;  %783 = vmatpush3.msra.mxu1 %v28_v10 }
  0x16   :  { %790 = vmatprep.subr.mxu1 %v902_v49  ;;  %802 = vmatpush3.msra.mxu0 %v33_v48 }
  0x17   :  { %803 = vmatprep.subr.mxu0 %v902_v49 }
  0x18   :  { %775 = vmatmul.mubr.msk.f32.gmra.mxu0 %vm49_vm1, %v45_v8 }
  0x19   :  { %804 = vmatpush3.msra.mxu0 %v32_v50  ;;  %809 = vmatprep.mubr.msk.f32.mxu0 %vm903_vm3, %v902_v49 }
  0x1a   :  { %805 = vmatprep.subr.mxu0 %v902_v49 }
  0x1b   :  { %806 = vmatpush3.msra.mxu0 %v31_v51 }
  0x1c   :  { %807 = vmatprep.subr.mxu0 %v902_v49 }
  0x1d   :  { %808 = vmatpush3.msra.mxu0 %v30_v52 }
  0x1e   :  { %823 = vmatprep.subr.mxu0 %v902_v49 }
  0xd0   :  { %v770_v11 = vpop.f32.mrf.mxu0 }
  0xd1   :  { %v184_v24 = vmax.f32 %v770_v11, 0.0 }
  0xd2   :  { %v144_v12 = vpop.f32.mrf.mxu0  ;;  %v779_v14 = vpop.f32.mrf.mxu1 }
  0xd3   :  { %v183_v20 = vmax.f32 %v144_v12, 0.0  ;;  %v190_v27 = vmax.f32 %v779_v14, 0.0 }
  0xd4   :  { %v773_v13 = vpop.f32.mrf.mxu0  ;;  %v174_v16 = vpop.f32.mrf.mxu1 }
  0xd5   :  { %v189_v22 = vmax.f32 %v174_v16, 0.0  ;;  %v186_v26 = vmax.f32 %v773_v13, 0.0 }
  0xd6   :  { %v154_v15 = vpop.f32.mrf.mxu0 }
  0xd7   :  { %v185_v21 = vmax.f32 %v154_v15, 0.0  ;;  %v194_v30 = vmax.f32 %v186_v26, %v190_v27 }
  0xd8   :  { %v776_v17 = vpop.f32.mrf.mxu0 }
  0xd9   :  { %v188_v18 = vmax.f32 %v776_v17, 0.0  ;;  %v193_v29 = vmax.f32 %v185_v21, %v189_v22 }
  0xda   :  { %v164_v19 = vpop.f32.mrf.mxu0 }
  0xdb   :  { %v187_v23 = vmax.f32 %v164_v19, 0.0  ;;  %v192_v28 = vmax.f32 %v184_v24, %v188_v18 }
  0xdd   :  { %v191_v25 = vmax.f32 %v183_v20, %v187_v23 }
  0xdf   :  { %784 = vmatprep.mubr.msk.f32.mxu1 %vm199_vm2, %v191_v25 }
  0xe0   :  { %785 = vmatmul.mubr.msk.f32.vlgmr.msra.gmra.mxu1 %vm199_vm2, %v192_v28 }
  0xe1   :  { %787 = vmatprep.mubr.msk.f32.mxu1 %vm199_vm2, %v193_v29  ;;  %791 = vmatpush3.msra.mxu1 %v33_v48 }
  0xe2   :  { %792 = vmatprep.subr.mxu1 %v902_v49 }
  0xe3   :  { %793 = vmatpush3.msra.mxu1 %v32_v50 }
  0xe4   :  { %788 = vmatmul.mubr.msk.f32.gmra.mxu1 %vm199_vm2, %v194_v30  ;;  %794 = vmatprep.subr.mxu1 %v902_v49 }
  0xe5   :  { %798 = vmatprep.mubr.msk.f32.mxu1 %vm903_vm3, %v902_v49  ;;  %795 = vmatpush3.msra.mxu1 %v31_v51 }
  0xe6   :  { %796 = vmatprep.subr.mxu1 %v902_v49 }
  0xe7   :  { %797 = vmatpush3.msra.mxu1 %v30_v52 }
  0xe8   :  { %812 = vmatprep.subr.mxu1 %v902_v49 }
 0x1a0   :  { %v786_v32 = vpop.f32.mrf.mxu1 }
 0x1a1   :  { %v965_v33 = vadd.f32 %v786_v32, %v962_v31 }
 0x1a2   :  { %v278_v34 = vpop.f32.mrf.mxu1 }
 0x1a3   :  { %v279_v35 = vadd.f32 %v962_v31, %v278_v34 }
 0x1a4   :  { %v789_v36 = vpop.f32.mrf.mxu1 }
 0x1a5   :  { %843 = vtanh.f32 %v279_v35  ;;  %v969_v37 = vadd.f32 %v789_v36, %v962_v31  ;;  %v722_v39 = vmul.f32 -1.442695, %v279_v35 }
 0x1a6   :  { %v288_v57 = vpop.f32.mrf.mxu1 }
 0x1a7   :  { %845 = vpow2.f32 %v722_v39  ;;  %v289_v11 = vadd.f32 %v962_v31, %v288_v57 }
 0x1b2   :  { %v844_v38 = vpop.eup %843 }
 0x1b3   :  { %306 = vrot.lane.b32.xlu0 %v844_v38, %s900_s0 }
 0x1b4   :  { %v846_v40 = vpop.eup %845 }
 0x1b5   :  { %v300_v41 = vadd.f32 1.0, %v846_v40 }
 0x1b7   :  { %847 = vrcp.f32 %v300_v41 }
 0x1c4   :  { %v848_v42 = vpop.eup %847 }
 0x1c5   :  { %v304_v45 = vmul.f32 0.0, %v848_v42 }
 0x225   :  { %v307_v43 = vpop.permute.xlu0 %306 }
 0x226   :  { %v309_v44 = vmul.f32 %v848_v42, %v307_v43  ;;  %v37_v43 = vld [vmem:[#allocation2 + $0x48] sm:$0xff] }
 0x228   :  { %311 = vrot.lane.b32.xlu0 %v309_v44, %s901_s8  ;;  %v36_v44 = vld [vmem:[#allocation2 + $0x40] sm:$0xff] }
 0x29a   :  { %v312_v46 = vpop.permute.xlu0 %311 }
 0x29b   :  { %v314_v47 = vadd.f32 %v312_v46, %v304_v45  ;;  %v35_v45 = vld [vmem:[#allocation2 + $0x38] sm:$0xff] }
 0x29d   :  { %849 = vtanh.f32 %v314_v47 }
 0x2aa   :  { %v850_v53 = vpop.eup %849 }
 0x2ab   :  { %317 = vrot.lane.b32.xlu1 %v850_v53, %s900_s0 }
 0x31d   :  { %v318_v54 = vpop.permute.xlu1 %317 }
 0x31e   :  { %v320_v55 = vmul.f32 %v848_v42, %v318_v54 }
 0x320   :  { %322 = vrot.lane.b32.xlu1 %v320_v55, %s901_s8 }
 0x392   :  { %v323_v56 = vpop.permute.xlu1 %322 }
 0x393   :  { %799 = vmatmul.mubr.msk.f32.vlgmr.msra.gmra.mxu1 %vm324_vm4, %v323_v56 }
 0x394   :  { %813 = vmatpush3.msra.mxu1 %v33_v48  ;;  %820 = vmatprep.mubr.msk.f32.mxu1 %vm903_vm3, %v902_v49 }
 0x395   :  { %814 = vmatprep.subr.mxu1 %v902_v49 }
 0x396   :  { %815 = vmatpush3.msra.mxu1 %v32_v50 }
 0x397   :  { %816 = vmatprep.subr.mxu1 %v902_v49 }
 0x398   :  { %817 = vmatpush3.msra.mxu1 %v31_v51  ;;  %v729_v51 = vld [vmem:[#allocation2 + $0x58] ss:$0 sm:$0xff] }
 0x399   :  { %818 = vmatprep.subr.mxu1 %v902_v49 }
 0x39a   :  { %819 = vmatpush3.msra.mxu1 %v30_v52 }
 0x453   :  { %v393_v58 = vpop.f32.mrf.mxu1 }
 0x454   :  { %v397_v59 = vadd.f32 %v393_v58, %v965_v33 }
 0x455   :  { %v800_v60 = vpop.f32.mrf.mxu1 }
 0x456   :  { %851 = vtanh.f32 %v397_v59  ;;  %v724_v62 = vmul.f32 -1.442695, %v397_v59 }
 0x458   :  { %853 = vpow2.f32 %v724_v62 }
 0x463   :  { %v852_v61 = vpop.eup %851 }
 0x464   :  { %407 = vrot.lane.b32.xlu0 %v852_v61, %s900_s0 }
 0x465   :  { %v854_v63 = vpop.eup %853 }
 0x466   :  { %v401_v0 = vadd.f32 1.0, %v854_v63 }
 0x468   :  { %855 = vrcp.f32 %v401_v0 }
 0x475   :  { %v856_v1 = vpop.eup %855 }
 0x476   :  { %v405_v4 = vmul.f32 %v856_v1, %v314_v47 }
 0x4d6   :  { %v408_v2 = vpop.permute.xlu0 %407 }
 0x4d7   :  { %v410_v3 = vmul.f32 %v856_v1, %v408_v2 }
 0x4d9   :  { %412 = vrot.lane.b32.xlu1 %v410_v3, %s901_s8 }
 0x54b   :  { %v413_v5 = vpop.permute.xlu1 %412 }
 0x54c   :  { %v415_v6 = vadd.f32 %v413_v5, %v405_v4 }
 0x54e   :  { %857 = vtanh.f32 %v415_v6 }
 0x55b   :  { %v858_v7 = vpop.eup %857 }
 0x55c   :  { %418 = vrot.lane.b32.xlu0 %v858_v7, %s900_s0 }
 0x5ce   :  { %v419_v8 = vpop.permute.xlu0 %418 }
 0x5cf   :  { %v421_v9 = vmul.f32 %v856_v1, %v419_v8 }
 0x5d1   :  { %423 = vrot.lane.b32.xlu1 %v421_v9, %s901_s8 }
 0x643   :  { %v424_v10 = vpop.permute.xlu1 %423 }
 0x644   :  { %810 = vmatmul.mubr.msk.f32.vlgmr.msra.gmra.mxu0 %vm324_vm4, %v424_v10 }
 0x645   :  { %831 = vmatprep.mubr.msk.f32.mxu0 %vm903_vm3, %v902_v49 }
 0x704   :  { %v493_v12 = vpop.f32.mrf.mxu0 }
 0x705   :  { %v497_v13 = vadd.f32 %v493_v12, %v289_v11 }
 0x706   :  { %v811_v14 = vpop.f32.mrf.mxu0 }
 0x707   :  { %859 = vtanh.f32 %v497_v13  ;;  %v726_v16 = vmul.f32 -1.442695, %v497_v13 }
 0x709   :  { %861 = vpow2.f32 %v726_v16 }
 0x714   :  { %v860_v15 = vpop.eup %859 }
 0x715   :  { %507 = vrot.lane.b32.xlu0 %v860_v15, %s900_s0 }
 0x716   :  { %v862_v17 = vpop.eup %861 }
 0x717   :  { %v501_v18 = vadd.f32 1.0, %v862_v17 }
 0x719   :  { %863 = vrcp.f32 %v501_v18 }
 0x726   :  { %v864_v19 = vpop.eup %863 }
 0x727   :  { %v505_v22 = vmul.f32 %v864_v19, %v415_v6 }
 0x787   :  { %v508_v20 = vpop.permute.xlu0 %507 }
 0x788   :  { %v510_v21 = vmul.f32 %v864_v19, %v508_v20 }
 0x78a   :  { %512 = vrot.lane.b32.xlu1 %v510_v21, %s901_s8 }
 0x7fc   :  { %v513_v23 = vpop.permute.xlu1 %512 }
 0x7fd   :  { %v515_v24 = vadd.f32 %v513_v23, %v505_v22 }
 0x7ff   :  { %865 = vtanh.f32 %v515_v24 }
 0x80c   :  { %v866_v25 = vpop.eup %865 }
 0x80d   :  { %518 = vrot.lane.b32.xlu0 %v866_v25, %s900_s0 }
 0x87f   :  { %v519_v26 = vpop.permute.xlu0 %518 }
 0x880   :  { %v521_v27 = vmul.f32 %v864_v19, %v519_v26 }
 0x882   :  { %523 = vrot.lane.b32.xlu1 %v521_v27, %s901_s8 }
 0x8f4   :  { %v524_v28 = vpop.permute.xlu1 %523 }
 0x8f5   :  { %821 = vmatmul.mubr.msk.f32.vlgmr.msra.gmra.mxu1 %vm324_vm4, %v524_v28 }
 0x9b5   :  { %v593_v29 = vpop.f32.mrf.mxu1 }
 0x9b6   :  { %v597_v30 = vadd.f32 %v593_v29, %v969_v37  ;;  %v38_v37 = vld [vmem:[#allocation2 + $0x50] sm:$0xff] }
 0x9b7   :  { %v822_v31 = vpop.f32.mrf.mxu1  ;;  %824 = vmatpush3.msra.mxu0 %v38_v37 }
 0x9b8   :  { %867 = vtanh.f32 %v597_v30  ;;  %v728_v33 = vmul.f32 -1.442695, %v597_v30  ;;  %825 = vmatprep.subr.mxu0 %v902_v49 }
 0x9b9   :  { %826 = vmatpush3.msra.mxu0 %v37_v43 }
 0x9ba   :  { %869 = vpow2.f32 %v728_v33  ;;  %827 = vmatprep.subr.mxu0 %v902_v49 }
 0x9bb   :  { %828 = vmatpush3.msra.mxu0 %v36_v44 }
 0x9bc   :  { %829 = vmatprep.subr.mxu0 %v902_v49 }
 0x9bd   :  { %830 = vmatpush3.msra.mxu0 %v35_v45 }
 0x9c5   :  { %v868_v32 = vpop.eup %867 }
 0x9c6   :  { %607 = vrot.lane.b32.xlu0 %v868_v32, %s900_s0 }
 0x9c7   :  { %v870_v34 = vpop.eup %869 }
 0x9c8   :  { %v601_v35 = vadd.f32 1.0, %v870_v34 }
 0x9ca   :  { %871 = vrcp.f32 %v601_v35 }
 0x9d7   :  { %v872_v36 = vpop.eup %871 }
 0x9d8   :  { %v605_v40 = vmul.f32 %v872_v36, %v515_v24 }
 0xa38   :  { %v608_v38 = vpop.permute.xlu0 %607 }
 0xa39   :  { %v610_v39 = vmul.f32 %v872_v36, %v608_v38 }
 0xa3b   :  { %612 = vrot.lane.b32.xlu1 %v610_v39, %s901_s8 }
 0xaad   :  { %v613_v41 = vpop.permute.xlu1 %612 }
 0xaae   :  { %v615_v42 = vadd.f32 %v613_v41, %v605_v40 }
 0xab0   :  { %873 = vtanh.f32 %v615_v42 }
 0xabd   :  { %v874_v46 = vpop.eup %873 }
 0xabe   :  { %618 = vrot.lane.b32.xlu0 %v874_v46, %s900_s0 }
 0xb30   :  { %v619_v47 = vpop.permute.xlu0 %618 }
 0xb31   :  { %v621_v48 = vmul.f32 %v872_v36, %v619_v47 }
 0xb33   :  { %627 = vrot.lane.b32.xlu1 %v621_v48, %s901_s8 }
 0xba5   :  { %v628_v50 = vpop.permute.xlu1 %627 }
 0xba6   :  { %832 = vmatmul.mubr.msk.f32.vlgmr.msra.gmra.mxu0 %vm324_vm4, %v628_v50 }
 0xc66   :  { %v697_v52 = vpop.f32.mrf.mxu0 }
 0xc67   :  { %v698_v53 = vadd.f32 %v729_v51, %v697_v52 }
 0xc68   :  { %v833_v54 = vpop.f32.mrf.mxu0 }
 0xc69   :  { %702 = vst.msk [vmem:[%s1024_s3] sm:$0xff] %vm701_vm5, %v698_v53 }
 0xc6a   :  { %707 = vsyncpa [#allocation3], 1 }

</bundles_post_ra>
